<compile_context>
chip_gen: v7x
topology: tpu7x:2x2x1
jax: 0.10.0
libtpu: 0.0.40
codegen_flags: <defaults>
</compile_context>

<pallas_src>
import functools

import jax
import jax.numpy as jnp
from jax.experimental import pallas as pl
from jax.experimental.pallas import tpu as pltpu


def _pick_tile(n, target):
    """Largest multiple-of-8 divisor of n that is <= target; falls back to n (single block)."""
    if n <= target:
        return n
    t = (target // 8) * 8
    while t >= 8:
        if n % t == 0:
            return t
        t -= 8
    return n


# ----------------------------- gate kernel -----------------------------

def _gate_kernel(x_ref, wg_ref, bg_ref, idx_ref, psum_ref):
    x = x_ref[...]                                                        # (tm, D) f32
    logits = jnp.dot(x, wg_ref[...], preferred_element_type=jnp.float32) + bg_ref[...]
    m = jnp.max(logits, axis=-1, keepdims=True)
    ez = jnp.exp(logits - m)                                              # EUP, padded lanes -> 0
    probs = ez / jnp.sum(ez, axis=-1, keepdims=True)                      # (tm, Epad) f32

    # first-occurrence argmax via a float max-reduce (avoids integer lane reductions on the XLU)
    epad = float(probs.shape[-1])
    col = jax.lax.broadcasted_iota(jnp.int32, probs.shape, 1).astype(jnp.float32)
    pmax = jnp.max(probs, axis=-1, keepdims=True)
    score = jnp.where(probs == pmax, epad - col, 0.0)
    idx_ref[...] = (epad - jnp.max(score, axis=-1, keepdims=True)).astype(jnp.int32)
    psum_ref[...] = jnp.sum(probs, axis=0, keepdims=True)                 # (1, Epad) partial sums


def gate_forward(flat_x, wg, bg):
    T, D = flat_x.shape
    E = wg.shape[1]
    e_pad = ((E + 127) // 128) * 128
    # Pad the expert axis to a full lane width; padded logits get a -1e30 bias so the softmax /
    # argmax never select them (their probability underflows to exactly 0).
    wg_p = jnp.zeros((D, e_pad), jnp.float32).at[:, :E].set(wg)
    bg_p = jnp.full((1, e_pad), -1e30, jnp.float32).at[:, :E].set(bg)

    tm = _pick_tile(T, 256)
    nt = T // tm

    idx, psum = pl.pallas_call(
        _gate_kernel,
        out_shape=(jax.ShapeDtypeStruct((T, 1), jnp.int32),
                   jax.ShapeDtypeStruct((nt, e_pad), jnp.float32)),
        grid=(nt,),
        in_specs=[
            pl.BlockSpec((tm, D), lambda i: (i, 0)),
            pl.BlockSpec((D, e_pad), lambda i: (0, 0)),
            pl.BlockSpec((1, e_pad), lambda i: (0, 0)),
        ],
        out_specs=(pl.BlockSpec((tm, 1), lambda i: (i, 0)),
                   pl.BlockSpec((1, e_pad), lambda i: (i, 0))),
        compiler_params=pltpu.CompilerParams(
            dimension_semantics=("parallel",),
            vmem_limit_bytes=32 * 1024 * 1024),
        cost_estimate=pl.CostEstimate(
            flops=2 * T * D * e_pad,
            transcendentals=T * e_pad,
            bytes_accessed=4 * (T * D + D * e_pad + e_pad + T + nt * e_pad)),
    )(flat_x, wg_p, bg_p)
    return idx[:, 0], jnp.sum(psum[:, :E], axis=0)      # (T,) int32 routing, (E,) prob sums


# ----------------------------- experts kernel (grouped matmul) -----------------------------

def _experts_kernel(cnt_ref, x_ref, w1_ref, b1_ref, w2_ref, b2_ref, o_ref):
    e = pl.program_id(0)
    g = pl.program_id(1)
    tg = o_ref.shape[1]
    cnt = cnt_ref[e]                                    # routed-token count of this expert (SMEM)

    @pl.when(g * tg < cnt)
    def _():
        x = x_ref[0]                                                      # (tg, D) bf16
        h = jnp.dot(x, w1_ref[0], preferred_element_type=jnp.float32) + b1_ref[0]
        h = jnp.maximum(h, 0.0)                                           # f32 ReLU on the VPU
        y = jnp.dot(h.astype(jnp.bfloat16), w2_ref[0],
                    preferred_element_type=jnp.float32) + b2_ref[0]
        o_ref[0] = y

    @pl.when(g * tg >= cnt)
    def _():
        o_ref[...] = jnp.zeros_like(o_ref)   # dead tile (its rows are dropped by the scatter)


def experts_forward(xg, counts, w1, b1, w2, b2):
    E, Gp, D = xg.shape
    tg = _pick_tile(Gp, 256)
    n_tg = Gp // tg
    # TODO(synk): for very large D (v7x 64 MiB VMEM) additionally tile W1/W2 along K/N.

    bytes_accessed = (counts.size * 4 + xg.size * 2 + w1.size * 2 + w2.size * 2
                      + b1.size * 4 + b2.size * 4 + E * Gp * D * 4)
    return pl.pallas_call(
        _experts_kernel,
        out_shape=jax.ShapeDtypeStruct((E, Gp, D), jnp.float32),
        grid_spec=pltpu.PrefetchScalarGridSpec(
            num_scalar_prefetch=1,
            grid=(E, n_tg),                  # expert outer => W1/W2 blocks DMA'd once per expert
            in_specs=[
                pl.BlockSpec((1, tg, D), lambda e, g, cnt: (e, g, 0)),    # routed token tile
                pl.BlockSpec((1, D, D), lambda e, g, cnt: (e, 0, 0)),     # W1[e] (bf16)
                pl.BlockSpec((1, 1, D), lambda e, g, cnt: (e, 0, 0)),     # b1[e] (f32)
                pl.BlockSpec((1, D, D), lambda e, g, cnt: (e, 0, 0)),     # W2[e] (bf16)
                pl.BlockSpec((1, 1, D), lambda e, g, cnt: (e, 0, 0)),     # b2[e] (f32)
            ],
            out_specs=pl.BlockSpec((1, tg, D), lambda e, g, cnt: (e, g, 0)),
        ),
        compiler_params=pltpu.CompilerParams(
            # every (expert, token-tile) step writes a disjoint output block and there is no
            # cross-step accumulation, so both axes are parallel (megacore sharding on v7x).
            dimension_semantics=("parallel", "parallel"),
            vmem_limit_bytes=32 * 1024 * 1024),
        cost_estimate=pl.CostEstimate(
            flops=4 * E * Gp * D * D,
            transcendentals=0,
            bytes_accessed=int(bytes_accessed)),
    )(counts, xg, w1, b1, w2, b2)


# ----------------------------- routing glue (plain JAX) -----------------------------

def _route_token_mask(expert_indices_2d, num_experts, capacity):
    """Exact replica of the PyTorch token_mask construction, including the quirk that
    `token_mask[indices] = expert` uses the 2-D (b, s) nonzero result, so BOTH the batch index
    and the sequence index of every kept token are written into the flat mask."""
    B, S = expert_indices_2d.shape
    total = B * S
    flat_ei = expert_indices_2d.reshape(-1)              # row-major == torch.nonzero order
    pos = jnp.arange(total, dtype=jnp.int32)
    b_idx = pos // S
    s_idx = pos % S
    tm = jnp.full((total + 1,), -1, jnp.int32)            # extra slot absorbs dropped writes
    for e in range(num_experts):
        hit = flat_ei == e
        rank = jnp.cumsum(hit.astype(jnp.int32)) - hit.astype(jnp.int32)
        keep = hit & (rank < capacity)                     # first min(N, capacity) tokens
        tm = tm.at[jnp.where(keep, b_idx, total)].set(e)
        tm = tm.at[jnp.where(keep, s_idx, total)].set(e)
    # TODO(synk): the degenerate capacity < 2 slicing of a squeezed single-row nonzero result
    # (which would write only the batch index) is not replicated; never hit at these shapes.
    return tm[:total]


def _group_tokens(token_mask, num_experts, group_size):
    """Per-expert gather indices (E, group_size) into flat_x (sentinel == T for padding)
    plus per-expert routed-token counts (E,) int32 (used for in-kernel tile skipping)."""
    T = token_mask.shape[0]
    pos = jnp.arange(T, dtype=jnp.int32)
    eid = jnp.arange(num_experts, dtype=token_mask.dtype)
    hit = token_mask[None, :] == eid[:, None]              # (E, T) disjoint across experts
    counts = jnp.sum(hit, axis=1).astype(jnp.int32)
    cand = jnp.where(hit, pos[None, :], jnp.int32(T))      # valid positions, else sentinel T
    cand = jnp.sort(cand, axis=1)                          # valid first (ascending), sentinels last
    if group_size <= T:
        gidx = cand[:, :group_size]
    else:
        pad = jnp.full((num_experts, group_size - T), T, jnp.int32)
        gidx = jnp.concatenate([cand, pad], axis=1)
    return gidx, counts


def sparse_moe_forward(params, x, num_experts, capacity_factor=1.25):
    B, S, D = x.shape
    total = B * S
    capacity = int(total / num_experts * capacity_factor)
    flat_x = x.reshape(total, D)

    # --- gating (Pallas): routing indices + per-expert prob sums; no (T, E) tensor in HBM ---
    idx_flat, prob_sum = gate_forward(flat_x, params["wg"], params["bg"])
    expert_indices = idx_flat.reshape(B, S)

    # --- reference-exact routing + grouping (data-dependent gather, kept in plain JAX) ---
    token_mask = _route_token_mask(expert_indices, num_experts, capacity)
    # Each expert receives at most min(2*capacity, total) flat positions (<= capacity kept tokens,
    # each writing its batch index and its sequence index into the mask).
    group = max(min(2 * capacity, total), 1)
    group = ((group + 7) // 8) * 8                          # sublane-align the token slab
    gidx, counts = _group_tokens(token_mask, num_experts, group)

    xpad = jnp.concatenate([flat_x, jnp.zeros((1, D), flat_x.dtype)], axis=0)
    xg = jnp.take(xpad, gidx, axis=0).astype(jnp.bfloat16)  # (E, group, D) bf16 MXU operand

    # --- expert FFN (Pallas grouped matmul over routed tokens only) ---
    yg = experts_forward(xg, counts, params["w1"], params["b1"],
                         params["w2"], params["b2"])         # (E, group, D) f32

    # Scatter back: sentinel rows land in the extra slot and are dropped; unrouted tokens
    # (token_mask == -1) stay zero, exactly like the reference's zero-initialized output.
    out = jnp.zeros((total + 1, D), jnp.float32).at[gidx.reshape(-1)].set(
        yg.reshape(-1, D))[:total]
    output = out.reshape(B, S, D)

    # --- load-balancing loss ---
    expert_probs = prob_sum / total                          # mean gate prob per expert
    expert_density = jnp.bincount(idx_flat, length=num_experts) / total
    expert_losses = expert_probs * expert_density * (num_experts ** 2)
    expert_loss = expert_losses.mean()
    return output, expert_loss


def init_params(key, dim_model, num_experts):
    # deterministic, PyTorch-Linear-like uniform(-1/sqrt(fan_in), 1/sqrt(fan_in))
    def uniform(k, shape, fan_in):
        bound = 1.0 / (fan_in ** 0.5)
        return jax.random.uniform(k, shape, jnp.float32, -bound, bound)

    ks = jax.random.split(key, 6)
    return {
        "wg": uniform(ks[0], (dim_model, num_experts), dim_model),
        "bg": uniform(ks[1], (1, num_experts), dim_model),
        # expert weights stored bf16 in HBM (MXU operands, converted once at init); biases stay f32.
        "w1": uniform(ks[2], (num_experts, dim_model, dim_model), dim_model).astype(jnp.bfloat16),
        "b1": uniform(ks[3], (num_experts, 1, dim_model), dim_model),
        "w2": uniform(ks[4], (num_experts, dim_model, dim_model), dim_model).astype(jnp.bfloat16),
        "b2": uniform(ks[5], (num_experts, 1, dim_model), dim_model),
    }


if __name__ == "__main__":
    B, S, D, E = 2, 8, 32, 4
    key = jax.random.PRNGKey(0)
    kx, kp = jax.random.split(key)
    x = jax.random.normal(kx, (B, S, D), jnp.float32)
    params = init_params(kp, D, E)

    fwd = jax.jit(functools.partial(sparse_moe_forward, num_experts=E,
                                    capacity_factor=1.25))
    output, expert_loss = fwd(params, x)
    jax.block_until_ready((output, expert_loss))
    assert output.shape == (B, S, D) and output.dtype == jnp.float32
    assert expert_loss.shape == () and expert_loss.dtype == jnp.float32
    print("KERNEL_OK")
</pallas_src>

<mosaic_0001>
module attributes {stable_mosaic.version = 11 : i64} {
  func.func private @main(%arg0: i32) attributes {dimension_semantics = [#tpu.dimension_semantics<core_parallel>], iteration_bounds = array<i64: 2>, tpu.core_type = #tpu.core_type<sc_scalar_subcore>, window_params = []} {
    return
  }
}

module attributes {stable_mosaic.version = 11 : i64} {
  func.func private @main(%arg0: i32) attributes {dimension_semantics = [#tpu.dimension_semantics<core_parallel>], iteration_bounds = array<i64: 2>, tpu.core_type = #tpu.core_type<sc_scalar_subcore>, window_params = []} {
    return
  }
}

module attributes {stable_mosaic.version = 11 : i64} {
  func.func @_gate_kernel(%arg0: i32, %arg1: memref<16x32xf32, #tpu.memory_space<vmem>>, %arg2: memref<32x128xf32, #tpu.memory_space<vmem>>, %arg3: memref<1x128xf32, #tpu.memory_space<vmem>>, %arg4: memref<16x1xi32, #tpu.memory_space<vmem>>, %arg5: memref<1x128xf32, #tpu.memory_space<vmem>>) attributes {dimension_semantics = [#tpu.dimension_semantics<parallel>], iteration_bounds = array<i64: 1>, scalar_prefetch = 0 : i64, scratch_operands = 0 : i64, tpu.core_type = #tpu.core_type<tc>, window_params = [{transform_indices = @transform_0, window_bounds = array<i64: 16, 32>}, {pipeline_mode = #tpu.pipeline_mode<synchronous>, transform_indices = @transform_1, window_bounds = array<i64: 32, 128>}, {pipeline_mode = #tpu.pipeline_mode<synchronous>, transform_indices = @transform_2, window_bounds = array<i64: 1, 128>}, {transform_indices = @transform_3, window_bounds = array<i64: 16, 1>}, {transform_indices = @transform_4, window_bounds = array<i64: 1, 128>}]} {
    %c0 = arith.constant 0 : index
    %c0_0 = arith.constant 0 : index
    %0 = vector.load %arg1[%c0, %c0_0] : memref<16x32xf32, #tpu.memory_space<vmem>>, vector<16x32xf32>
    %c0_1 = arith.constant 0 : index
    %c0_2 = arith.constant 0 : index
    %1 = vector.load %arg2[%c0_1, %c0_2] : memref<32x128xf32, #tpu.memory_space<vmem>>, vector<32x128xf32>
    %cst = arith.constant dense<0.000000e+00> : vector<16x128xf32>
    %2 = tpu.matmul %0, %1, %cst {dimension_numbers = #tpu.dot_dimension_numbers<[1], [0], [0], [1], [0, 0, 1, 1], [], []>} : vector<16x32xf32>, vector<32x128xf32>, vector<16x128xf32> -> vector<16x128xf32>
    %c0_3 = arith.constant 0 : index
    %c0_4 = arith.constant 0 : index
    %3 = vector.load %arg3[%c0_3, %c0_4] : memref<1x128xf32, #tpu.memory_space<vmem>>, vector<1x128xf32>
    %4 = vector.broadcast %3 : vector<1x128xf32> to vector<16x128xf32>
    %5 = arith.addf %2, %4 : vector<16x128xf32>
    %cst_5 = arith.constant dense<0xFF800000> : vector<16xf32>
    %6 = vector.multi_reduction <maximumf>, %5, %cst_5 [1] : vector<16x128xf32> to vector<16xf32>
    %7 = vector.shape_cast %6 : vector<16xf32> to vector<16x1xf32>
    %8 = vector.broadcast %7 : vector<16x1xf32> to vector<16x128xf32>
    %9 = arith.subf %5, %8 : vector<16x128xf32>
    %10 = math.exp %9 : vector<16x128xf32>
    %cst_6 = arith.constant dense<0.000000e+00> : vector<16xf32>
    %11 = vector.multi_reduction <add>, %10, %cst_6 [1] : vector<16x128xf32> to vector<16xf32>
    %12 = vector.shape_cast %11 : vector<16xf32> to vector<16x1xf32>
    %13 = vector.broadcast %12 : vector<16x1xf32> to vector<16x128xf32>
    %14 = arith.divf %10, %13 : vector<16x128xf32>
    %15 = tpu.iota {dimensions = array<i32: 1>} : vector<16x128xi32>
    %16 = arith.sitofp %15 : vector<16x128xi32> to vector<16x128xf32>
    %cst_7 = arith.constant dense<0xFF800000> : vector<16xf32>
    %17 = vector.multi_reduction <maximumf>, %14, %cst_7 [1] : vector<16x128xf32> to vector<16xf32>
    %18 = vector.shape_cast %17 : vector<16xf32> to vector<16x1xf32>
    %19 = vector.broadcast %18 : vector<16x1xf32> to vector<16x128xf32>
    %20 = arith.cmpf oeq, %14, %19 : vector<16x128xf32>
    %cst_8 = arith.constant 1.280000e+02 : f32
    %21 = vector.broadcast %cst_8 : f32 to vector<16x128xf32>
    %22 = arith.subf %21, %16 : vector<16x128xf32>
    %cst_9 = arith.constant 0.000000e+00 : f32
    %23 = vector.broadcast %cst_9 : f32 to vector<16x128xf32>
    %24 = arith.select %20, %22, %23 : vector<16x128xi1>, vector<16x128xf32>
    %cst_10 = arith.constant dense<0xFF800000> : vector<16xf32>
    %25 = vector.multi_reduction <maximumf>, %24, %cst_10 [1] : vector<16x128xf32> to vector<16xf32>
    %26 = vector.shape_cast %25 : vector<16xf32> to vector<16x1xf32>
    %cst_11 = arith.constant 1.280000e+02 : f32
    %27 = vector.broadcast %cst_11 : f32 to vector<16x1xf32>
    %28 = arith.subf %27, %26 : vector<16x1xf32>
    %29 = arith.fptosi %28 : vector<16x1xf32> to vector<16x1xi32>
    %c0_12 = arith.constant 0 : index
    %c0_13 = arith.constant 0 : index
    %30 = vector.load %arg4[%c0_12, %c0_13] : memref<16x1xi32, #tpu.memory_space<vmem>>, vector<16x1xi32>
    tpu.vector_store %arg4[%c0_12, %c0_13], %29 {strides = array<i32>} : memref<16x1xi32, #tpu.memory_space<vmem>>, vector<16x1xi32>,
    %cst_14 = arith.constant dense<0.000000e+00> : vector<128xf32>
    %31 = vector.multi_reduction <add>, %14, %cst_14 [0] : vector<16x128xf32> to vector<128xf32>
    %32 = vector.shape_cast %31 : vector<128xf32> to vector<1x128xf32>
    %c0_15 = arith.constant 0 : index
    %c0_16 = arith.constant 0 : index
    %33 = vector.load %arg5[%c0_15, %c0_16] : memref<1x128xf32, #tpu.memory_space<vmem>>, vector<1x128xf32>
    tpu.vector_store %arg5[%c0_15, %c0_16], %32 {strides = array<i32>} : memref<1x128xf32, #tpu.memory_space<vmem>>, vector<1x128xf32>,
    return
  }
  func.func @transform_0(%arg0: i32) -> (i32, i32) {
    %c0_i32 = arith.constant 0 : i32
    %c0_i32_0 = arith.constant 0 : i32
    return %arg0, %c0_i32 : i32, i32
  }
  func.func @transform_1(%arg0: i32) -> (i32, i32) {
    %c0_i32 = arith.constant 0 : i32
    %c0_i32_0 = arith.constant 0 : i32
    %c0_i32_1 = arith.constant 0 : i32
    return %c0_i32, %c0_i32_0 : i32, i32
  }
  func.func @transform_2(%arg0: i32) -> (i32, i32) {
    %c0_i32 = arith.constant 0 : i32
    %c0_i32_0 = arith.constant 0 : i32
    %c0_i32_1 = arith.constant 0 : i32
    return %c0_i32, %c0_i32_0 : i32, i32
  }
  func.func @transform_3(%arg0: i32) -> (i32, i32) {
    %c0_i32 = arith.constant 0 : i32
    %c0_i32_0 = arith.constant 0 : i32
    return %arg0, %c0_i32 : i32, i32
  }
  func.func @transform_4(%arg0: i32) -> (i32, i32) {
    %c0_i32 = arith.constant 0 : i32
    %c0_i32_0 = arith.constant 0 : i32
    return %arg0, %c0_i32 : i32, i32
  }
}

module attributes {stable_mosaic.version = 11 : i64} {
  func.func @_experts_kernel(%arg0: i32, %arg1: i32, %arg2: memref<4xi32, #tpu.memory_space<smem>>, %arg3: memref<1x16x32xbf16, #tpu.memory_space<vmem>>, %arg4: memref<1x32x32xbf16, #tpu.memory_space<vmem>>, %arg5: memref<1x1x32xf32, #tpu.memory_space<vmem>>, %arg6: memref<1x32x32xbf16, #tpu.memory_space<vmem>>, %arg7: memref<1x1x32xf32, #tpu.memory_space<vmem>>, %arg8: memref<1x16x32xf32, #tpu.memory_space<vmem>>) attributes {dimension_semantics = [#tpu.dimension_semantics<parallel>, #tpu.dimension_semantics<parallel>], iteration_bounds = array<i64: 4, 1>, scalar_prefetch = 1 : i64, scratch_operands = 0 : i64, tpu.core_type = #tpu.core_type<tc>, window_params = [{transform_indices = @transform_0, window_bounds = array<i64: 1, 16, 32>}, {transform_indices = @transform_1, window_bounds = array<i64: 1, 32, 32>}, {transform_indices = @transform_2, window_bounds = array<i64: 1, 1, 32>}, {transform_indices = @transform_3, window_bounds = array<i64: 1, 32, 32>}, {transform_indices = @transform_4, window_bounds = array<i64: 1, 1, 32>}, {transform_indices = @transform_5, window_bounds = array<i64: 1, 16, 32>}]} {
    %0 = arith.index_cast %arg0 : i32 to index
    %1 = memref.load %arg2[%0] : memref<4xi32, #tpu.memory_space<smem>>
    %c16_i32 = arith.constant 16 : i32
    %2 = arith.muli %arg1, %c16_i32 : i32
    %3 = arith.cmpi slt, %2, %1 : i32
    %4 = arith.extui %3 : i1 to i32
    %c0_i32 = arith.constant 0 : i32
    %5 = arith.cmpi ne, %4, %c0_i32 : i32
    scf.if %5 {
      %c0 = arith.constant 0 : index
      %c0_2 = arith.constant 0 : index
      %c0_3 = arith.constant 0 : index
      %10 = vector.load %arg3[%c0, %c0_2, %c0_3] : memref<1x16x32xbf16, #tpu.memory_space<vmem>>, vector<1x16x32xbf16>
      %11 = vector.shape_cast %10 : vector<1x16x32xbf16> to vector<16x32xbf16>
      %c0_4 = arith.constant 0 : index
      %c0_5 = arith.constant 0 : index
      %c0_6 = arith.constant 0 : index
      %12 = vector.load %arg4[%c0_4, %c0_5, %c0_6] : memref<1x32x32xbf16, #tpu.memory_space<vmem>>, vector<1x32x32xbf16>
      %13 = vector.shape_cast %12 : vector<1x32x32xbf16> to vector<32x32xbf16>
      %cst = arith.constant dense<0.000000e+00> : vector<16x32xf32>
      %14 = tpu.matmul %11, %13, %cst {dimension_numbers = #tpu.dot_dimension_numbers<[1], [0], [0], [1], [0, 0, 1, 1], [], []>} : vector<16x32xbf16>, vector<32x32xbf16>, vector<16x32xf32> -> vector<16x32xf32>
      %c0_7 = arith.constant 0 : index
      %c0_8 = arith.constant 0 : index
      %c0_9 = arith.constant 0 : index
      %15 = vector.load %arg5[%c0_7, %c0_8, %c0_9] : memref<1x1x32xf32, #tpu.memory_space<vmem>>, vector<1x1x32xf32>
      %16 = vector.shape_cast %15 : vector<1x1x32xf32> to vector<1x32xf32>
      %17 = vector.broadcast %16 : vector<1x32xf32> to vector<16x32xf32>
      %18 = arith.addf %14, %17 : vector<16x32xf32>
      %cst_10 = arith.constant 0.000000e+00 : f32
      %19 = vector.broadcast %cst_10 : f32 to vector<16x32xf32>
      %20 = arith.maximumf %18, %19 : vector<16x32xf32>
      %21 = arith.truncf %20 : vector<16x32xf32> to vector<16x32xbf16>
      %c0_11 = arith.constant 0 : index
      %c0_12 = arith.constant 0 : index
      %c0_13 = arith.constant 0 : index
      %22 = vector.load %arg6[%c0_11, %c0_12, %c0_13] : memref<1x32x32xbf16, #tpu.memory_space<vmem>>, vector<1x32x32xbf16>
      %23 = vector.shape_cast %22 : vector<1x32x32xbf16> to vector<32x32xbf16>
      %cst_14 = arith.constant dense<0.000000e+00> : vector<16x32xf32>
      %24 = tpu.matmul %21, %23, %cst_14 {dimension_numbers = #tpu.dot_dimension_numbers<[1], [0], [0], [1], [0, 0, 1, 1], [], []>} : vector<16x32xbf16>, vector<32x32xbf16>, vector<16x32xf32> -> vector<16x32xf32>
      %c0_15 = arith.constant 0 : index
      %c0_16 = arith.constant 0 : index
      %c0_17 = arith.constant 0 : index
      %25 = vector.load %arg7[%c0_15, %c0_16, %c0_17] : memref<1x1x32xf32, #tpu.memory_space<vmem>>, vector<1x1x32xf32>
      %26 = vector.shape_cast %25 : vector<1x1x32xf32> to vector<1x32xf32>
      %27 = vector.broadcast %26 : vector<1x32xf32> to vector<16x32xf32>
      %28 = arith.addf %24, %27 : vector<16x32xf32>
      %c0_18 = arith.constant 0 : index
      %c0_19 = arith.constant 0 : index
      %c0_20 = arith.constant 0 : index
      %29 = vector.load %arg8[%c0_18, %c0_19, %c0_20] : memref<1x16x32xf32, #tpu.memory_space<vmem>>, vector<1x16x32xf32>
      %30 = vector.shape_cast %29 : vector<1x16x32xf32> to vector<16x32xf32>
      %31 = vector.shape_cast %28 : vector<16x32xf32> to vector<1x16x32xf32>
      tpu.vector_store %arg8[%c0_18, %c0_19, %c0_20], %31 {strides = array<i32>} : memref<1x16x32xf32, #tpu.memory_space<vmem>>, vector<1x16x32xf32>,
    } else {
    }
    %c16_i32_0 = arith.constant 16 : i32
    %6 = arith.muli %arg1, %c16_i32_0 : i32
    %7 = arith.cmpi sge, %6, %1 : i32
    %8 = arith.extui %7 : i1 to i32
    %c0_i32_1 = arith.constant 0 : i32
    %9 = arith.cmpi ne, %8, %c0_i32_1 : i32
    scf.if %9 {
      %cst = arith.constant 0.000000e+00 : f32
      %10 = vector.broadcast %cst : f32 to vector<1x16x32xf32>
      %c0 = arith.constant 0 : index
      %c0_2 = arith.constant 0 : index
      %c0_3 = arith.constant 0 : index
      %11 = vector.load %arg8[%c0, %c0_2, %c0_3] : memref<1x16x32xf32, #tpu.memory_space<vmem>>, vector<1x16x32xf32>
      tpu.vector_store %arg8[%c0, %c0_2, %c0_3], %10 {strides = array<i32>} : memref<1x16x32xf32, #tpu.memory_space<vmem>>, vector<1x16x32xf32>,
    } else {
    }
    return
  }
  func.func @transform_0(%arg0: i32, %arg1: i32, %arg2: memref<4xi32, #tpu.memory_space<smem>>) -> (i32, i32, i32) {
    %c0_i32 = arith.constant 0 : i32
    %c0_i32_0 = arith.constant 0 : i32
    return %arg0, %arg1, %c0_i32 : i32, i32, i32
  }
  func.func @transform_1(%arg0: i32, %arg1: i32, %arg2: memref<4xi32, #tpu.memory_space<smem>>) -> (i32, i32, i32) {
    %c0_i32 = arith.constant 0 : i32
    %c0_i32_0 = arith.constant 0 : i32
    %c0_i32_1 = arith.constant 0 : i32
    return %arg0, %c0_i32, %c0_i32_0 : i32, i32, i32
  }
  func.func @transform_2(%arg0: i32, %arg1: i32, %arg2: memref<4xi32, #tpu.memory_space<smem>>) -> (i32, i32, i32) {
    %c0_i32 = arith.constant 0 : i32
    %c0_i32_0 = arith.constant 0 : i32
    %c0_i32_1 = arith.constant 0 : i32
    return %arg0, %c0_i32, %c0_i32_0 : i32, i32, i32
  }
  func.func @transform_3(%arg0: i32, %arg1: i32, %arg2: memref<4xi32, #tpu.memory_space<smem>>) -> (i32, i32, i32) {
    %c0_i32 = arith.constant 0 : i32
    %c0_i32_0 = arith.constant 0 : i32
    %c0_i32_1 = arith.constant 0 : i32
    return %arg0, %c0_i32, %c0_i32_0 : i32, i32, i32
  }
  func.func @transform_4(%arg0: i32, %arg1: i32, %arg2: memref<4xi32, #tpu.memory_space<smem>>) -> (i32, i32, i32) {
    %c0_i32 = arith.constant 0 : i32
    %c0_i32_0 = arith.constant 0 : i32
    %c0_i32_1 = arith.constant 0 : i32
    return %arg0, %c0_i32, %c0_i32_0 : i32, i32, i32
  }
  func.func @transform_5(%arg0: i32, %arg1: i32, %arg2: memref<4xi32, #tpu.memory_space<smem>>) -> (i32, i32, i32) {
    %c0_i32 = arith.constant 0 : i32
    %c0_i32_0 = arith.constant 0 : i32
    return %arg0, %arg1, %c0_i32 : i32, i32, i32
  }
}

</mosaic_0001>

<bundles_post_ra>
// kernel: sparse_moe_forward.2
= control target key start
LH: loop header
LB: loop body
LE: loop exit
PB: predicated region body
PF: predicated region fallthrough
CT: control target
= control target key end

     0   :  { %vm29_vm0 = vcmask 261120   ;;  %v129_v34 = vlaneseq  ;;  %vm149_vm3 = vcmask 7168   ;;  %s263_s1 = inlined_call_operand.vmem [shape: f32[32,128], index: 1, kind: input, shape index: {}]   ;;  %s264_s0 = inlined_call_operand.vmem [shape: f32[16,32], index: 0, kind: input, shape index: {}]   ;;  %s265_s2 = inlined_call_operand.vmem [shape: f32[1,128], index: 2, kind: input, shape index: {}]   ;;  %s266_s4 = inlined_call_operand.vmem [shape: f32[1,128], index: 4, kind: output, shape index: {1}]   ;;  %s267_s3 = inlined_call_operand.vmem [shape: s32[16,1], index: 3, kind: output, shape index: {0}]  }
   0x1   :  { %v18_v0 = vld [vmem:[%s263_s1] sm:$0xff]  ;;  %v19_v1 = vld [vmem:[%s263_s1 + $0x8] sm:$0xff]  ;;  %v20_v2 = vld [vmem:[%s263_s1 + $0x10] sm:$0xff] }
   0x2   :  { %v188_v3 = vpack.c.bf16 %v19_v1, %v18_v0  ;;  %v21_v4 = vld [vmem:[%s263_s1 + $0x18] sm:$0xff]  ;;  %v16_v5 = vld [vmem:[%s264_s0] sm:$0xff]  ;;  %v17_v7 = vld [vmem:[%s264_s0 + $0x8] sm:$0xff]  ;;  %v130_v35 = vand.u32 127, %v129_v34 }
   0x3   :  { %v192_v6 = vpack.c.bf16 %v21_v4, %v20_v2  ;;  %185 = vmatprep.mubr.msk.f32.mxu0 %vm29_vm0, %v16_v5  ;;  %v168_v8 = vld [vmem:[%s265_s2] ss:$0 sm:$0xff] }
   0x4   :  { %189 = vmatprep.subr.bf16.mxu0 %v188_v3  ;;  %v131_v36 = vcvt.s32.f32 %v130_v35 }
   0x5   :  { %191 = vmatpush3.bf16.msra.mxu0 %v188_v3 }
   0x6   :  { %193 = vmatprep.subr.bf16.mxu0 %v192_v6  ;;  %v138_v37 = vsub.f32 128.0, %v131_v36 }
   0x9   :  { %195 = vmatpush3.bf16.msra.mxu0 %v192_v6 }
   0xc   :  { %186 = vmatmul.mubr.msk.f32.vlgmr.msra.gmra.mrb[0].mxu0 %vm29_vm0, %v17_v7 }
  0xdf   :  { %v187_v9 = vpop.f32.mrb[0].mxu0 }
  0xe0   :  { %v102_v10 = vpop.f32.mrb[1].mxu0  ;;  %v108_v12 = vadd.f32 %v187_v9, %v168_v8 }
  0xe1   :  { %v103_v11 = vadd.f32 %v168_v8, %v102_v10 }
  0xe3   :  { %111 = vmax.xlane.f32.xlu0 %v103_v11 }
  0xe7   :  { %113 = vmax.xlane.f32.xlu0 %v108_v12 }
 0x170   :  { %v112_v13 = vpop.xlane.xlu0 %111 }
 0x171   :  { %v115_v14 = vsub.f32 %v103_v11, %v112_v13 }
 0x173   :  { %v117_v15 = vmul.f32 1.442695, %v115_v14 }
 0x174   :  { %v114_v16 = vpop.xlane.xlu0 %113 }
 0x175   :  { %200 = vpow2.f32 %v117_v15  ;;  %v116_v17 = vsub.f32 %v108_v12, %v114_v16 }
 0x177   :  { %v119_v18 = vmul.f32 1.442695, %v116_v17 }
 0x179   :  { %202 = vpow2.f32 %v119_v18 }
 0x17f   :  { %v201_v19 = vpop.eup %200 }
 0x180   :  { %121 = vadd.xlane.f32.xlu1 %v201_v19 }
 0x183   :  { %v203_v20 = vpop.eup %202 }
 0x184   :  { %123 = vadd.xlane.f32.xlu1 %v203_v20 }
 0x20d   :  { %v122_v21 = vpop.xlane.xlu1 %121 }
 0x20e   :  { %204 = vrcp.f32 %v122_v21 }
 0x211   :  { %v124_v22 = vpop.xlane.xlu1 %123 }
 0x212   :  { %206 = vrcp.f32 %v124_v22 }
 0x218   :  { %v205_v23 = vpop.eup %204 }
 0x219   :  { %v126_v24 = vmul.f32 %v205_v23, %v201_v19 }
 0x21b   :  { %132 = vmax.xlane.f32.xlu0 %v126_v24 }
 0x21c   :  { %v207_v25 = vpop.eup %206 }
 0x21d   :  { %v128_v26 = vmul.f32 %v207_v25, %v203_v20 }
 0x21f   :  { %134 = vmax.xlane.f32.xlu1 %v128_v26  ;;  %v152_v27 = vadd.f32 %v128_v26, %v126_v24 }
 0x221   :  { %v153_v28 = vrot.slane %v152_v27, 4 }
 0x223   :  { %v154_v29 = vadd.f32 %v153_v28, %v152_v27 }
 0x225   :  { %v155_v30 = vrot.slane %v154_v29, 2 }
 0x227   :  { %v156_v31 = vadd.f32 %v155_v30, %v154_v29 }
 0x229   :  { %v157_v32 = vrot.slane %v156_v31, 1 }
 0x22b   :  { %v158_v33 = vadd.f32 %v157_v32, %v156_v31 }
 0x22d   :  { %159 = vst [vmem:[%s266_s4] sm:$0x1] %v158_v33 }
 0x2a8   :  { %v133_v38 = vpop.xlane.xlu0 %132 }
 0x2a9   :  { %vm136_vm1 = vcmp.eq.f32.partialorder %v126_v24, %v133_v38 }
 0x2aa   :  { %v139_v39 = vsel %vm136_vm1, %v138_v37, 0.0 }
 0x2ab   :  { %141 = vmax.xlane.f32.xlu0 %v139_v39 }
 0x2ac   :  { %v135_v40 = vpop.xlane.xlu1 %134 }
 0x2ad   :  { %vm137_vm2 = vcmp.eq.f32.partialorder %v128_v26, %v135_v40 }
 0x2ae   :  { %v140_v41 = vsel %vm137_vm2, %v138_v37, 0.0 }
 0x2af   :  { %143 = vmax.xlane.f32.xlu1 %v140_v41 }
 0x338   :  { %v142_v42 = vpop.xlane.xlu0 %141 }
 0x339   :  { %v145_v43 = vsub.f32 128.0, %v142_v42 }
 0x33b   :  { %v196_v44 = vtrunc.f32 %v145_v43 }
 0x33c   :  { %v144_v45 = vpop.xlane.xlu1 %143 }
 0x33d   :  { %v197_v46 = vcvt.f32.s32 %v196_v44  ;;  %v146_v47 = vsub.f32 128.0, %v144_v45 }
 0x33f   :  { %150 = vst.msk [vmem:[%s267_s3] sm:$0xff] %vm149_vm3, %v197_v46  ;;  %v198_v48 = vtrunc.f32 %v146_v47 }
 0x341   :  { %v199_v49 = vcvt.f32.s32 %v198_v48 }
 0x343   :  { %151 = vst.msk [vmem:[%s267_s3 + $0x8] sm:$0xff] %vm149_vm3, %v199_v49 }

// kernel: sparse_moe_forward.3
= control target key start
LH: loop header
LB: loop body
LE: loop exit
PB: predicated region body
PF: predicated region fallthrough
CT: control target
= control target key end

     0   :  { %s866_s0 = inlined_call_operand.vmem [shape: s32[4], index: 0, kind: input, shape index: {}]   ;;  %s867_s1 = inlined_call_operand.vmem [shape: bf16[4,16,32], index: 1, kind: input, shape index: {}]   ;;  %s868_s2 = inlined_call_operand.vmem [shape: bf16[4,32,32], index: 2, kind: input, shape index: {}]   ;;  %s869_s3 = inlined_call_operand.vmem [shape: f32[4,1,32], index: 3, kind: input, shape index: {}]   ;;  %s870_s4 = inlined_call_operand.vmem [shape: bf16[4,32,32], index: 4, kind: input, shape index: {}]   ;;  %s871_s5 = inlined_call_operand.vmem [shape: f32[4,1,32], index: 5, kind: input, shape index: {}]   ;;  %s872_s6 = inlined_call_operand.vmem [shape: f32[4,16,32], index: 6, kind: output, shape index: {}]  }
   0x1   :  { %s11_s23 = sshll.u32 %s866_s0, 4  ;;  %s12_s23 = int_to_ptr.vmem [resolvable:$true] %s11_s23 }
   0x2   :  { %s716_s24 = scalar_lea.vmem %s12_s23, 16  ;;  %p721_p1 = scmp.lt.s32.totalorder %s12_s23, %s12_s23 }
   0x3   :  { %p717_p0 = scmp.ne.s32.totalorder %s12_s23, %s716_s24  ;;  %p722_p2 = scmp.lt.s32.totalorder %s716_s24, %s716_s24 }
   0x5   :  { %p723_p3 = por %p722_p2, %p721_p1 }
   0x7   :  { %p724_p4 = pnand %p723_p3, %p717_p0 }
   0x9   :  { %727 = shalt.err (!%p724_p4)  }
   0xa   :  { %s754_s25 = smov [#allocation3]  }
   0xb   :  { %14 = dma.vmem_to_smem %s12_s23, 16, %s754_s25, [#allocation2] }
   0xc   :  { %740 = dma.done.wait [#allocation2], 16 }
   0xd   :  { %741 = vsyncadd [#allocation2], 4294967280 }
   0xe   :  { %16 = sfence }
   0xf   :  { %s796_s26 = smov 0   ;;  %s798_s27 = smov 0  }
  0x10   :  { %s800_s28 = smov 0  }
  0x11 LB: > { %s34_s0 = sadd.s32 1, %s748_s27  ;;  %p633_p5 = scmp.ge.s32.totalorder %s752_s28, 1  ;;  %s752_s28 = sphi %s800_s28, %s22_s28   ;;  %s748_s27 = sphi %s798_s27, %s874_s27   ;;  %s744_s26 = sphi %s796_s26, %s873_s26  }
  0x12   : > { %p36_p6 = scmp.ge.s32.totalorder %s34_s0, 4  ;;  %p251_p7 = scmp.lt.s32.totalorder %s752_s28, 5 }
  0x14   : > { %s876_s0 = smov (%p36_p6, %s34_s0), 0  ;;  %p252_p8 = pnand %p633_p5, %p251_p7 }
  0x15   : > { %p304_p9 = scmp.lt.s32.totalorder (!%p252_p8), %s744_s26, 3  ;;  %s814_s29 = sld [smem:[#allocation3 + %s744_s26]] (!%p252_p8) }
  0x16   : > { %255 = sbr.rel (%p252_p8) target bundleno = 486 (0x1e6), region = 40 }
  0x1b   : > { %p643_p10 = scmp.le.s32.totalorder (!%p252_p8), %s814_s29, 0 }
  0x1d   : > { %s878_s26 = smov (!%p304_p9, %s744_s26), 3  ;;  %345 = sbr.rel (%p643_p10) target bundleno = 477 (0x1dd), region = 44 }
  0x1e   : > { %s657_s30 = sshll.u32 %s878_s26, 3  ;;  %s658_s7 = sshll.u32 %s878_s26, 4  ;;  %v755_v1 = vmov (!%p643_p10), 0.0   ;;  %vm756_vm0 = vmmov (!%p643_p10), 0   ;;  %vm376_vm1 = vcmask (!%p643_p10), 261120  }
  0x1f   : > { %s311_s10 = scalar_lea.vmem %s867_s1, %s657_s30  ;;  %s317_s13 = scalar_lea.vmem %s868_s2, %s658_s7  ;;  %667 = vmatprep.subr.bf16.mxu0 (!%p643_p10), %v755_v1  ;;  %675 = vmatprep.subr.bf16.mxu1 (!%p643_p10), %v755_v1 }
  0x20   : > { %s320_s16 = scalar_lea.vmem %s869_s3, %s878_s26  ;;  %s325_s19 = scalar_lea.vmem %s870_s4, %s658_s7  ;;  %v711_v0 = vld [vmem:[%s317_s13] sm:$0xff] (!%p643_p10)   ;;  %v712_v2 = vld [vmem:[%s317_s13 + $0x8] sm:$0xff] (!%p643_p10)   ;;  %671 = vmatprep.mubr.msk.bf16.mxu0 (!%p643_p10), %vm756_vm0, %v755_v1  ;;  %679 = vmatprep.mubr.msk.bf16.mxu1 (!%p643_p10), %vm756_vm0, %v755_v1 }
  0x21   : > { %s328_s22 = scalar_lea.vmem %s871_s5, %s878_s26  ;;  %s840_s25 = scalar_lea.vmem %s872_s6, %s658_s7  ;;  %668 = vmatpush3.bf16.msra.mxu0 (!%p643_p10), %v711_v0  ;;  %v713_v3 = vld [vmem:[%s311_s10] sm:$0xff] (!%p643_p10)   ;;  %v715_v5 = vld [vmem:[%s325_s19 + $0x8] sm:$0xff] (!%p643_p10)  }
  0x22   : > { %669 = vmatprep.subr.bf16.mxu0 (!%p643_p10), %v755_v1  ;;  %v714_v4 = vld [vmem:[%s325_s19] sm:$0xff] (!%p643_p10)  }
  0x23   : > { %676 = vmatpush3.bf16.msra.mxu1 (!%p643_p10), %v714_v4  ;;  %v644_v6 = vld [vmem:[%s320_s16] ss:$0 sm:$0xff] (!%p643_p10) }
  0x24   : > { %677 = vmatprep.subr.bf16.mxu1 %v755_v1  ;;  %v649_v16 = vld [vmem:[%s328_s22] ss:$0 sm:$0xff] }
  0x25   : > { %670 = vmatpush3.bf16.msra.mxu0 %v712_v2 }
  0x27   : > { %678 = vmatpush3.bf16.msra.mxu1 %v715_v5 }
  0x28   : > { %672 = vmatmul.mubr.msk.bf16.vlgmr.msra.gmra.mrb[0].mxu0 %vm376_vm1, %v713_v3 }
  0xfb   : > { %v414_v7 = vpop.f32.mrb[0].mxu0 }
  0xfc   : > { %v415_v8 = vadd.f32 %v644_v6, %v414_v7  ;;  %v673_v9 = vpop.f32.mrb[1].mxu0 }
  0xfd   : > { %v417_v10 = vpop.f32.mrb[2].mxu0 }
  0xfe   : > { %v418_v11 = vadd.f32 %v644_v6, %v417_v10  ;;  %v674_v12 = vpop.f32.mrb[3].mxu0  ;;  %v421_v13 = vmax.f32 %v415_v8, 0.0 }
 0x100   : > { %v422_v14 = vmax.f32 %v418_v11, 0.0 }
 0x102   : > { %v423_v15 = vpack.c.bf16 %v422_v14, %v421_v13 }
 0x104   : > { %680 = vmatmul.mubr.msk.bf16.vlgmr.msra.gmra.mrb[0].mxu1 %vm376_vm1, %v423_v15 }
 0x1d7   : > { %v484_v17 = vpop.f32.mrb[0].mxu1 }
 0x1d8   : > { %v485_v18 = vadd.f32 %v649_v16, %v484_v17  ;;  %v681_v19 = vpop.f32.mrb[1].mxu1 }
 0x1d9   : > { %v487_v20 = vpop.f32.mrb[2].mxu1 }
 0x1da   : > { %491 = vst.msk [vmem:[%s840_s25] sm:$0xff] %vm376_vm1, %v485_v18  ;;  %v488_v21 = vadd.f32 %v649_v16, %v487_v20  ;;  %v682_v22 = vpop.f32.mrb[3].mxu1 }
 0x1dc   : > { %492 = vst.msk [vmem:[%s840_s25 + $0x8] sm:$0xff] %vm376_vm1, %v488_v21 }
 0x1dd PF: > { %p654_p11 = scmp.gt.s32.totalorder %s814_s29, 0 }
 0x1de   : > { %vm497_vm2 = vcmask (!%p654_p11), 261120   ;;  %v757_v23 = vmov (!%p654_p11), 0.0  }
 0x1df   : > { %496 = sbr.rel (%p654_p11) target bundleno = 486 (0x1e6), region = 48  ;;  %498 = vst.msk [vmem:[%s840_s25] sm:$0xff] (!%p654_p11), %vm497_vm2, %v757_v23  ;;  %499 = vst.msk [vmem:[%s840_s25 + $0x8] sm:$0xff] (!%p654_p11), %vm497_vm2, %v757_v23 }
 0x1e6 PF: > { %s22_s28 = sadd.s32 1, %s752_s28   ;;  %s873_s26 = smov %s748_s27 }
 0x1e7   : > { %p19_p12 = scmp.ge.s32.totalorder %s22_s28, 6   ;;  %s874_s27 = smov %s876_s0 }
 0x1e9   :  { %21 = sbr.rel (!%p19_p12) target bundleno = 17 (0x11), region = 90 }

</bundles_post_ra>
